<compile_context>
chip_gen: v7x
topology: tpu7x:2x2x1
jax: 0.10.0
libtpu: 0.0.40
codegen_flags: <defaults>
</compile_context>

<pallas_src>
import jax
import jax.numpy as jnp
import numpy as np
from jax.experimental import pallas as pl
from jax.experimental.pallas import tpu as pltpu

EPS = 1e-5  # PyTorch BatchNorm2d default eps
_VMEM_LIMIT = 48 * 1024 * 1024  # above 16/32 MiB scoped defaults, under v7x 64 MiB


def _stats_kernel(x_ref, sum_ref, ssq_ref):
    """Accumulate per-channel sum and sum-of-squares over HW tiles."""
    # x_ref: (1, C, thw); sum_ref / ssq_ref: (1, C, 1) VMEM-resident accumulators.
    @pl.when(pl.program_id(1) == 0)
    def _init():
        sum_ref[...] = jnp.zeros_like(sum_ref)
        ssq_ref[...] = jnp.zeros_like(ssq_ref)

    x = x_ref[...].astype(jnp.float32)
    sum_ref[...] += jnp.sum(x, axis=2, keepdims=True)
    ssq_ref[...] += jnp.sum(x * x, axis=2, keepdims=True)


def _apply_kernel(x_ref, scale_ref, shift_ref, o_ref):
    """out = x * scale + shift with per-(n, c) scale/shift (fused BN + cond affine)."""
    x = x_ref[...].astype(jnp.float32)
    o_ref[...] = (x * scale_ref[...] + shift_ref[...]).astype(o_ref.dtype)


def _choose_hw_tile(hw, c, itemsize=4, target_bytes=2 * 1024 * 1024):
    """Largest lane tile (multiple of 128 dividing hw) near a per-block byte budget."""
    if hw % 128 != 0:
        return hw  # unaligned extent: block must span the full dim
    max_t = max(128, (target_bytes // max(c * itemsize, 1)) // 128 * 128)
    t = min(hw, max_t)
    while t >= 128:
        if hw % t == 0:
            return t
        t -= 128
    return hw


def conditional_batchnorm2d(x, y, embed_weight, bn_weight, bn_bias):
    """Training-mode ConditionalBatchNorm2d forward.

    x: (N, C, H, W) float, y: (N,) int32 class ids,
    embed_weight: (num_classes, 2C), bn_weight / bn_bias: (C,).
    """
    N, C, H, W = x.shape
    HW = H * W
    x3 = x.reshape(N, C, HW)
    thw = _choose_hw_tile(HW, C, jnp.dtype(x.dtype).itemsize)
    n_hw = HW // thw
    grid = (N, n_hw)

    # ---- pass 1: per-channel batch statistics (sum, sum of squares) --------
    sums, ssqs = pl.pallas_call(
        _stats_kernel,
        out_shape=(
            jax.ShapeDtypeStruct((N, C, 1), jnp.float32),
            jax.ShapeDtypeStruct((N, C, 1), jnp.float32),
        ),
        grid=grid,
        in_specs=[pl.BlockSpec((1, C, thw), lambda n, h: (n, 0, h))],
        out_specs=(
            pl.BlockSpec((1, C, 1), lambda n, h: (n, 0, 0)),
            pl.BlockSpec((1, C, 1), lambda n, h: (n, 0, 0)),
        ),
        compiler_params=pltpu.CompilerParams(
            dimension_semantics=("parallel", "arbitrary"),
            vmem_limit_bytes=_VMEM_LIMIT,
        ),
    )(x3)

    # ---- tiny per-(n, c) glue: fold BN affine + conditional affine ---------
    cnt = jnp.float32(N * HW)
    ch_sum = jnp.sum(sums, axis=0)                        # (C, 1)
    ch_ssq = jnp.sum(ssqs, axis=0)                        # (C, 1)
    mean = ch_sum / cnt                                   # (C, 1)
    var = jnp.maximum(ch_ssq / cnt - mean * mean, 0.0)    # biased var (training BN)
    inv = jax.lax.rsqrt(var + EPS)                        # (C, 1)

    gb = embed_weight[y].astype(jnp.float32)              # (N, 2C) embedding lookup
    gamma = gb[:, :C]                                     # (N, C)
    beta = gb[:, C:]                                      # (N, C)
    g_w = (gamma * bn_weight[None, :].astype(jnp.float32))[:, :, None]          # (N, C, 1)
    g_b = (gamma * bn_bias[None, :].astype(jnp.float32) + beta)[:, :, None]     # (N, C, 1)
    scale = g_w * inv[None]                               # gamma * bn_w * inv
    shift = g_b - mean[None] * scale                      # beta + gamma*bn_b - mean*scale

    # ---- pass 2: streamed fused affine  out = x * scale + shift ------------
    # NOTE: in production, reuse x's HBM buffer for the output via
    # input_output_aliases={0: 0}; omitted here because the test re-reads x.
    out3 = pl.pallas_call(
        _apply_kernel,
        out_shape=jax.ShapeDtypeStruct((N, C, HW), x.dtype),
        grid=grid,
        in_specs=[
            pl.BlockSpec((1, C, thw), lambda n, h: (n, 0, h)),
            pl.BlockSpec((1, C, 1), lambda n, h: (n, 0, 0)),
            pl.BlockSpec((1, C, 1), lambda n, h: (n, 0, 0)),
        ],
        out_specs=pl.BlockSpec((1, C, thw), lambda n, h: (n, 0, h)),
        compiler_params=pltpu.CompilerParams(
            dimension_semantics=("parallel", "parallel"),
            vmem_limit_bytes=_VMEM_LIMIT,
        ),
    )(x3, scale, shift)
    return out3.reshape(N, C, H, W)


def reference(x, y, embed_weight, bn_weight, bn_bias):
    # Pure-JAX reference replicating PyTorch training-mode forward.
    mean = jnp.mean(x, axis=(0, 2, 3), keepdims=True)
    var = jnp.mean((x - mean) ** 2, axis=(0, 2, 3), keepdims=True)
    xhat = (x - mean) / jnp.sqrt(var + EPS)
    out = xhat * bn_weight.reshape(1, -1, 1, 1) + bn_bias.reshape(1, -1, 1, 1)
    gb = embed_weight[y]
    C = x.shape[1]
    gamma = gb[:, :C].reshape(-1, C, 1, 1)
    beta = gb[:, C:].reshape(-1, C, 1, 1)
    return gamma * out + beta


if __name__ == "__main__":
    N, C, H, W = 2, 4, 16, 16
    num_classes = 8

    key = jax.random.PRNGKey(0)
    kx, ke = jax.random.split(key)

    x = jax.random.normal(kx, (N, C, H, W), dtype=jnp.float32)
    y = jnp.array([1, 3], dtype=jnp.int32)

    # Embedding weight follows the module's __init__ ([ones | zeros] per class)
    # plus a small deterministic perturbation so the conditional affine is exercised.
    embed_init = jnp.concatenate(
        [jnp.ones((num_classes, C)), jnp.zeros((num_classes, C))], axis=1
    )
    embed_weight = embed_init + 0.05 * jax.random.normal(
        ke, (num_classes, 2 * C), dtype=jnp.float32
    )
    bn_weight = jnp.ones((C,), dtype=jnp.float32)   # nn.BatchNorm2d defaults
    bn_bias = jnp.zeros((C,), dtype=jnp.float32)

    out = conditional_batchnorm2d(x, y, embed_weight, bn_weight, bn_bias)
    out = jax.block_until_ready(out)

    ref = reference(x, y, embed_weight, bn_weight, bn_bias)
    np.testing.assert_allclose(np.asarray(out), np.asarray(ref), rtol=1e-5, atol=1e-5)

    print("KERNEL_OK")
</pallas_src>

<mosaic_0001>
module attributes {stable_mosaic.version = 11 : i64} {
  func.func @_stats_kernel(%arg0: i32, %arg1: i32, %arg2: memref<1x4x256xf32, #tpu.memory_space<vmem>>, %arg3: memref<1x4x1xf32, #tpu.memory_space<vmem>>, %arg4: memref<1x4x1xf32, #tpu.memory_space<vmem>>) attributes {dimension_semantics = [#tpu.dimension_semantics<parallel>, #tpu.dimension_semantics<arbitrary>], iteration_bounds = array<i64: 2, 1>, scalar_prefetch = 0 : i64, scratch_operands = 0 : i64, tpu.core_type = #tpu.core_type<tc>, window_params = [{transform_indices = @transform_0, window_bounds = array<i64: 1, 4, 256>}, {transform_indices = @transform_1, window_bounds = array<i64: 1, 4, 1>}, {transform_indices = @transform_2, window_bounds = array<i64: 1, 4, 1>}]} {
    %c0_i32 = arith.constant 0 : i32
    %0 = arith.cmpi eq, %arg1, %c0_i32 : i32
    %1 = arith.extui %0 : i1 to i32
    %c0_i32_0 = arith.constant 0 : i32
    %2 = arith.cmpi ne, %1, %c0_i32_0 : i32
    scf.if %2 {
      %cst_16 = arith.constant 0.000000e+00 : f32
      %15 = vector.broadcast %cst_16 : f32 to vector<1x4x1xf32>
      %c0_17 = arith.constant 0 : index
      %c0_18 = arith.constant 0 : index
      %c0_19 = arith.constant 0 : index
      %16 = vector.load %arg3[%c0_17, %c0_18, %c0_19] : memref<1x4x1xf32, #tpu.memory_space<vmem>>, vector<1x4x1xf32>
      tpu.vector_store %arg3[%c0_17, %c0_18, %c0_19], %15 {strides = array<i32>} : memref<1x4x1xf32, #tpu.memory_space<vmem>>, vector<1x4x1xf32>,
      %cst_20 = arith.constant 0.000000e+00 : f32
      %17 = vector.broadcast %cst_20 : f32 to vector<1x4x1xf32>
      %c0_21 = arith.constant 0 : index
      %c0_22 = arith.constant 0 : index
      %c0_23 = arith.constant 0 : index
      %18 = vector.load %arg4[%c0_21, %c0_22, %c0_23] : memref<1x4x1xf32, #tpu.memory_space<vmem>>, vector<1x4x1xf32>
      tpu.vector_store %arg4[%c0_21, %c0_22, %c0_23], %17 {strides = array<i32>} : memref<1x4x1xf32, #tpu.memory_space<vmem>>, vector<1x4x1xf32>,
    } else {
    }
    %c0 = arith.constant 0 : index
    %c0_1 = arith.constant 0 : index
    %c0_2 = arith.constant 0 : index
    %3 = vector.load %arg2[%c0, %c0_1, %c0_2] : memref<1x4x256xf32, #tpu.memory_space<vmem>>, vector<1x4x256xf32>
    %c0_3 = arith.constant 0 : index
    %c0_4 = arith.constant 0 : index
    %c0_5 = arith.constant 0 : index
    %4 = vector.load %arg3[%c0_3, %c0_4, %c0_5] : memref<1x4x1xf32, #tpu.memory_space<vmem>>, vector<1x4x1xf32>
    %cst = arith.constant dense<0.000000e+00> : vector<1x4xf32>
    %5 = vector.multi_reduction <add>, %3, %cst [2] : vector<1x4x256xf32> to vector<1x4xf32>
    %6 = vector.shape_cast %5 : vector<1x4xf32> to vector<1x4x1xf32>
    %7 = arith.addf %4, %6 : vector<1x4x1xf32>
    %c0_6 = arith.constant 0 : index
    %c0_7 = arith.constant 0 : index
    %c0_8 = arith.constant 0 : index
    %8 = vector.load %arg3[%c0_6, %c0_7, %c0_8] : memref<1x4x1xf32, #tpu.memory_space<vmem>>, vector<1x4x1xf32>
    tpu.vector_store %arg3[%c0_6, %c0_7, %c0_8], %7 {strides = array<i32>} : memref<1x4x1xf32, #tpu.memory_space<vmem>>, vector<1x4x1xf32>,
    %c0_9 = arith.constant 0 : index
    %c0_10 = arith.constant 0 : index
    %c0_11 = arith.constant 0 : index
    %9 = vector.load %arg4[%c0_9, %c0_10, %c0_11] : memref<1x4x1xf32, #tpu.memory_space<vmem>>, vector<1x4x1xf32>
    %10 = arith.mulf %3, %3 : vector<1x4x256xf32>
    %cst_12 = arith.constant dense<0.000000e+00> : vector<1x4xf32>
    %11 = vector.multi_reduction <add>, %10, %cst_12 [2] : vector<1x4x256xf32> to vector<1x4xf32>
    %12 = vector.shape_cast %11 : vector<1x4xf32> to vector<1x4x1xf32>
    %13 = arith.addf %9, %12 : vector<1x4x1xf32>
    %c0_13 = arith.constant 0 : index
    %c0_14 = arith.constant 0 : index
    %c0_15 = arith.constant 0 : index
    %14 = vector.load %arg4[%c0_13, %c0_14, %c0_15] : memref<1x4x1xf32, #tpu.memory_space<vmem>>, vector<1x4x1xf32>
    tpu.vector_store %arg4[%c0_13, %c0_14, %c0_15], %13 {strides = array<i32>} : memref<1x4x1xf32, #tpu.memory_space<vmem>>, vector<1x4x1xf32>,
    return
  }
  func.func @transform_0(%arg0: i32, %arg1: i32) -> (i32, i32, i32) {
    %c0_i32 = arith.constant 0 : i32
    %c0_i32_0 = arith.constant 0 : i32
    return %arg0, %c0_i32, %arg1 : i32, i32, i32
  }
  func.func @transform_1(%arg0: i32, %arg1: i32) -> (i32, i32, i32) {
    %c0_i32 = arith.constant 0 : i32
    %c0_i32_0 = arith.constant 0 : i32
    %c0_i32_1 = arith.constant 0 : i32
    return %arg0, %c0_i32, %c0_i32_0 : i32, i32, i32
  }
  func.func @transform_2(%arg0: i32, %arg1: i32) -> (i32, i32, i32) {
    %c0_i32 = arith.constant 0 : i32
    %c0_i32_0 = arith.constant 0 : i32
    %c0_i32_1 = arith.constant 0 : i32
    return %arg0, %c0_i32, %c0_i32_0 : i32, i32, i32
  }
}

</mosaic_0001>

<bundles_post_ra>
// kernel: tpu_custom_call.1
= control target key start
LH: loop header
LB: loop body
LE: loop exit
PB: predicated region body
PF: predicated region fallthrough
CT: control target
= control target key end

     0   :  { %8 = vsyncpa [#allocation3], 0  ;;  %s630_s0 = inlined_call_operand.hbm [shape: f32[2,4,256], index: 0, kind: input, shape index: {}]   ;;  %s631_s1 = inlined_call_operand.vmem [shape: f32[2,4,1], index: 1, kind: output, shape index: {0}]   ;;  %s632_s2 = inlined_call_operand.vmem [shape: f32[2,4,1], index: 2, kind: output, shape index: {1}]  }
   0x1   :  { %10 = vsyncpa [#allocation3 + $0x1], 0  ;;  %s498_s9 = smov 0   ;;  %s500_s10 = smov 0  }
   0x2   :  { %s502_s11 = smov 0   ;;  %s504_s12 = smov 0  }
   0x3   :  { %s506_s13 = smov 0   ;;  %s508_s14 = smov 0  }
   0x4 LB: > { %s328_s15 = sadd.s32 4294967295, %s479_s14   ;;  %s28_s16 = sadd.s32 1, %s475_s13  ;;  %s479_s14 = sphi %s508_s14, %s16_s14   ;;  %s475_s13 = sphi %s506_s13, %s642_s13   ;;  %s471_s12 = sphi %s504_s12, %s641_s12   ;;  %s467_s11 = sphi %s502_s11, %s640_s11   ;;  %s463_s10 = sphi %s500_s10, %s639_s10   ;;  %s459_s9 = sphi %s498_s9, %s638_s9  }
   0x5   : > { %p30_p0 = scmp.ge.s32.totalorder %s28_s16, 2  ;;  %s37_s17 = sadd.s32 1, %s467_s11 }
   0x6   : > { %p44_p1 = scmp.ne.s32.totalorder %s467_s11, %s463_s10  ;;  %p45_p2 = scmp.eq.s32.totalorder %s479_s14, 0 }
   0x7   : > { %s644_s16 = smov (%p30_p0, %s28_s16), 0  ;;  %p50_p4 = scmp.ne.s32.totalorder %s463_s10, %s459_s9 }
   0x8   : > { %p534_p3 = por %p45_p2, %p44_p1  ;;  %s32_s19 = ssub.s32 %s475_s13, %s644_s16 }
   0x9   : > { %p51_p5 = scmp.eq.s32.totalorder %s328_s15, 0  ;;  %p35_p6 = scmp.eq.s32.totalorder %s32_s19, 0 }
   0xa   : > { %p348_p8 = scmp.lt.s32.totalorder %s479_s14, 2  ;;  %s126_s22 = sand.u32 1, %s467_s11  }
   0xb   : > { %p541_p7 = por %p51_p5, %p50_p4  ;;  %s341_s23 = sshll.u32 %s475_s13, 7 }
   0xc   : > { %s547_s21 = scalar_select %p35_p6, %s467_s11, %s37_s17  }
   0xd   : > { %s332_s24 = sshll.u32 %s126_s22, 3  ;;  %s554_s27 = scalar_lea.hbm %s630_s0, %s341_s23 }
   0xe   : > { %s130_s28 = scalar_lea.vmem [#allocation2], %s332_s24  ;;  %p558_p9 = pnand %p348_p8, %p534_p3 }
   0xf   : > { %s140_s29 = sshll.u32 %s130_s28, 4  ;;  %s127_s3 = scalar_lea.sflag [#allocation3], %s126_s22  ;;  %s562_s29 = int_to_ptr.vmem [resolvable:$true] %s140_s29 }
  0x10   : > { %s399_s4 = scalar_lea.hbm %s554_s27, 128  ;;  %p401_p13 = pneg %p558_p9 }
  0x11   : > { %p400_p12 = scmp.ne.s32.totalorder %s554_s27, %s399_s4  ;;  %s404_s7 = scalar_lea.hbm %s630_s0, 256 }
  0x12   : > { %p405_p2 = scmp.lt.u32.totalorder %s554_s27, %s630_s0  ;;  %p406_p3 = scmp.lt.u32.totalorder %s404_s7, %s399_s4 }
  0x13   : > { %p402_p0 = pnand %p401_p13, %p400_p12  ;;  %p408_p5 = scmp.lt.u32.totalorder %s399_s4, %s554_s27 }
  0x14   : > { %p407_p4 = por %p406_p3, %p405_p2 }
  0x15   : > { %p403_p1 = pneg %p402_p0 }
  0x16   : > { %p409_p6 = por %p408_p5, %p407_p4 }
  0x18   : > { %p410_p8 = pnand %p409_p6, %p403_p1 }
  0x1a   : > { %413 = shalt.err (!%p410_p8)
}
  0x1b   : > { %s414_s15 = scalar_lea.vmem %s562_s29, 128  ;;  %s481_s17 = smov [#allocation2]  }
  0x1c   : > { %p415_p12 = scmp.ne.s32.totalorder %s562_s29, %s414_s15  ;;  %s419_s18 = sshll.u32 %s481_s17, 4  ;;  %s420_s18 = int_to_ptr.vmem [resolvable:$false] %s419_s18 }
  0x1d   : > { %s421_s19 = scalar_lea.vmem %s420_s18, 256  ;;  %p422_p11 = scmp.lt.s32.totalorder %s562_s29, %s420_s18 }
  0x1e   : > { %p417_p0 = pnand %p415_p12, %p401_p13  ;;  %p423_p2 = scmp.lt.s32.totalorder %s421_s19, %s414_s15 }
  0x20   : > { %p418_p10 = pneg %p417_p0  ;;  %p424_p3 = por %p423_p2, %p422_p11 }
  0x22   : > { %p425_p4 = pnand %p424_p3, %p418_p10 }
  0x24   : > { %428 = shalt.err (!%p425_p4)
}
  0x25   : > { %347 = dma.hbm_to_vmem [thread:$0]  (!%p558_p9), %s554_s27, 128, %s562_s29, %s127_s3  }
  0x26   : > { %p636_p1 = scmp.lt.s32.totalorder %s479_s14, 3  ;;  %p637_p5 = scmp.ge.s32.totalorder %s479_s14, 1 }
  0x28   : > { %p146_p13 = pnand %p637_p5, %p636_p1 }
  0x29   : > { %s151_s22 = sand.u32 (!%p146_p13), 1, %s463_s10  }
  0x2a   : > { %149 = sbr.rel (%p146_p13) target bundleno = 205 (0xcd), region = 24  ;;  %s336_s23 = sshll.u32 (!%p146_p13), %s151_s22, 3 }
  0x2b   : > { %s152_s24 = scalar_lea.sflag (!%p146_p13), [#allocation3], %s151_s22  ;;  %s155_s25 = scalar_lea.vmem (!%p146_p13), [#allocation2], %s336_s23 }
  0x31   : > { %454 = dma.done.wait (%p541_p7), %s152_s24, 128  }
  0x32   : > { %456 = vsyncadd (%p541_p7), %s152_s24, 4294967168  ;;  %p180_p10 = scmp.lt.s32.totalorder %s471_s12, 1  ;;  %vm192_vm0 = vcmask 3072   ;;  %vm200_vm1 = vcmask 1043456   ;;  %v482_v0 = vmov 0.0   ;;  %v195_v1 = vld [vmem:[%s155_s25] sm:$0xff] }
  0x33   : > { %v198_v2 = vcombine.high %v195_v1, %v195_v1  ;;  %v201_v3 = vsel %vm200_vm1, %v195_v1, 0.0  ;;  %v210_v4 = vmul.f32 %v195_v1, %v195_v1 }
  0x34   : > { %s646_s12 = smov (!%p180_p10, %s471_s12), 1 }
  0x35   : > { %s337_s26 = sshll.u32 %s646_s12, 2  ;;  %v202_v5 = vsel %vm200_vm1, %v198_v2, 0.0  ;;  %v212_v6 = vcombine.high %v210_v4, %v210_v4  ;;  %v214_v7 = vsel %vm200_vm1, %v210_v4, 0.0 }
  0x36   : > { %s183_s29 = scalar_lea.vmem %s631_s1, %s337_s26  ;;  %v203_v8 = vadd.f32 %v202_v5, %v201_v3  ;;  %s187_s30 = scalar_lea.vmem %s632_s2, %s337_s26 }
  0x37   : > { %193 = vst.msk [vmem:[%s183_s29] sm:$0xf] %vm192_vm0, %v482_v0  ;;  %v215_v9 = vsel %vm200_vm1, %v212_v6, 0.0  ;;  %194 = vst.msk [vmem:[%s187_s30] sm:$0xf] %vm192_vm0, %v482_v0 }
  0x38   : > { %204 = vadd.xlane.f32.xlu0 %v203_v8  ;;  %v216_v10 = vadd.f32 %v215_v9, %v214_v7 }
  0x3c   : > { %217 = vadd.xlane.f32.xlu0 %v216_v10 }
  0x3e   : > { %v196_v11 = vld [vmem:[%s183_s29] sm:$0xf] }
  0x3f   : > { %v209_v14 = vld [vmem:[%s187_s30] sm:$0xf] }
  0xc5   : > { %v205_v12 = vpop.xlane.xlu0 %204 }
  0xc6   : > { %v206_v13 = vadd.f32 %v205_v12, %v196_v11 }
  0xc8   : > { %208 = vst.msk [vmem:[%s183_s29] sm:$0xf] %vm192_vm0, %v206_v13 }
  0xc9   : > { %v218_v15 = vpop.xlane.xlu0 %217 }
  0xca   : > { %v219_v16 = vadd.f32 %v218_v15, %v209_v14 }
  0xcc   : > { %220 = vst.msk [vmem:[%s187_s30] sm:$0xf] %vm192_vm0, %v219_v16 }
  0xcd PF: > { %s16_s14 = sadd.s32 1, %s479_s14   ;;  %s638_s9 = smov %s463_s10 }
  0xce   : > { %p13_p7 = scmp.ge.s32.totalorder %s16_s14, 4   ;;  %s639_s10 = smov %s467_s11 }
  0xcf   : > { %s640_s11 = smov %s547_s21  ;;  %s641_s12 = smov %s475_s13 }
  0xd0   : > { %s642_s13 = smov %s644_s16  ;;  %15 = sbr.rel (!%p13_p7) target bundleno = 4 (0x4), region = 80 }
  0xd7   :  { %254 = vsyncpa [#allocation3], 1 }
  0xd8   :  { %256 = vsyncpa [#allocation3 + $0x1], 1 }

</bundles_post_ra>
